<compile_context>
chip_gen: v7x
topology: tpu7x:2x2x1
jax: 0.10.0
libtpu: 0.0.40
codegen_flags: <defaults>
</compile_context>

<pallas_src>
import jax
import jax.numpy as jnp
from jax.experimental import pallas as pl
from jax.experimental.pallas import tpu as pltpu


_TARGET_STEP_BYTES = 2 << 20   # ~2 MiB of in+out activation bytes per grid step
_MAX_T_HW = 64 * 1024          # keeps double-buffered slabs inside default scoped VMEM


def _conv1x1_vpu_kernel(x_ref, w_ref, b_ref, o_ref):
    # x_ref: (Bt, Cin, t_hw)  activations, spatial on lanes
    # w_ref: (Cout, Cin)      1x1 conv weight
    # b_ref: (Cout, 1)        bias
    # o_ref: (Bt, Cout, t_hw) lane-dense output tile
    bt_n, cin, t_hw = x_ref.shape
    cout = o_ref.shape[1]
    w = w_ref[...].astype(jnp.float32)
    # Hoisted loop invariants (JAX does not CSE broadcasts inside loops).
    b_full = jnp.broadcast_to(b_ref[...].astype(jnp.float32), (cout, t_hw))
    w_cols = [w[:, ci:ci + 1] for ci in range(cin)]
    for bt in range(bt_n):
        x = x_ref[bt].astype(jnp.float32)           # (Cin, t_hw)
        acc = b_full
        # Unrolled FMA chain on the VPU; a (Cout,Cin)=(8,4) contraction would
        # use <0.1% of the MXU and only add push/FIFO latency on v5e/v6e.
        for ci in range(cin):
            acc = acc + w_cols[ci] * x[ci:ci + 1, :]
        o_ref[bt] = acc.astype(o_ref.dtype)


def _conv1x1_mxu_kernel(x_ref, w_ref, b_ref, o_ref):
    # Same contract as the VPU kernel, but the contraction runs on the MXU:
    # (Cout, Cin) @ (Cin, t_hw) per batch slice of the block.
    bt_n = x_ref.shape[0]
    w = w_ref[...]
    b = b_ref[...].astype(jnp.float32)
    for bt in range(bt_n):
        acc = jnp.dot(w, x_ref[bt], preferred_element_type=jnp.float32)
        o_ref[bt] = (acc + b).astype(o_ref.dtype)


def _prefer_mxu_for_chip():
    # On v7x the per-core HBM bandwidth (~3.2 TB/s) is high enough that the
    # VPU broadcast-FMA chain, not HBM, can become the limiter; the MXU slot
    # is otherwise idle, so route the contraction there.  Guarded so the
    # query never breaks compilation.
    try:
        info = pltpu.get_tpu_info()
        return "7" in str(getattr(info, "chip_version", ""))
    except Exception:
        return False


def _pick_tiles(n, cin, cout, hw, itemsize, t_hw):
    """Pick (t_hw, bt) so each grid step moves ~_TARGET_STEP_BYTES of activations."""
    bytes_per_lane = (cin + cout) * itemsize
    if t_hw is None:
        t = _TARGET_STEP_BYTES // max(1, bytes_per_lane)
        t = min(t, _MAX_T_HW)
    else:
        t = int(t_hw)
    # Lane-dim block must be a multiple of 128 or equal the full extent.
    t = max(128, (t // 128) * 128)
    if t >= hw:
        t = hw
    # Batch-tile only when one spatial tile already covers the whole image
    # (small-image case); pick the largest divisor of N under the byte target.
    if t == hw:
        bt = max(1, _TARGET_STEP_BYTES // max(1, hw * bytes_per_lane))
        bt = min(n, bt)
        while n % bt:
            bt -= 1
    else:
        bt = 1
    return t, bt


def input_channel_adapter(x, weight, bias, *, t_hw=None, prefer_mxu=None):
    """Forward pass of InputChannelAdapter (nn.Conv2d(in, out, kernel_size=1)).

    x:      (N, C_in, H, W)   -- NCHW, matching PyTorch
    weight: (C_out, C_in, 1, 1)
    bias:   (C_out,)
    returns (N, C_out, H, W), dtype of x (accumulation is f32 inside the kernel)
    """
    N, Cin, H, W = x.shape
    Cout = weight.shape[0]
    HW = H * W

    w2 = weight.reshape(Cout, Cin)
    b2 = bias.reshape(Cout, 1)
    x3 = x.reshape(N, Cin, HW)          # free reshape, no transpose

    itemsize = jnp.dtype(x.dtype).itemsize
    t_hw, bt = _pick_tiles(N, Cin, Cout, HW, itemsize, t_hw)

    ns = pl.cdiv(HW, t_hw)              # ragged last block handled by Pallas masking
    nb = N // bt

    # Put the larger parallel axis first so v7x's two TensorCores split evenly.
    if ns >= nb:
        grid = (ns, nb)
        xo_map = lambda s, n: (n, 0, s)
        wb_map = lambda s, n: (0, 0)
    else:
        grid = (nb, ns)
        xo_map = lambda n, s: (n, 0, s)
        wb_map = lambda n, s: (0, 0)

    if prefer_mxu is None:
        prefer_mxu = (Cin > 8) or (Cout > 32) or _prefer_mxu_for_chip()
    kernel = _conv1x1_mxu_kernel if prefer_mxu else _conv1x1_vpu_kernel

    out = pl.pallas_call(
        kernel,
        out_shape=jax.ShapeDtypeStruct((N, Cout, HW), x.dtype),
        grid_spec=pltpu.PrefetchScalarGridSpec(
            num_scalar_prefetch=0,
            grid=grid,
            in_specs=[
                pl.BlockSpec((bt, Cin, t_hw), xo_map),
                pl.BlockSpec((Cout, Cin), wb_map),
                pl.BlockSpec((Cout, 1), wb_map),
            ],
            out_specs=pl.BlockSpec((bt, Cout, t_hw), xo_map),
        ),
        compiler_params=pltpu.CompilerParams(
            dimension_semantics=("parallel", "parallel")),
    )(x3, w2, b2)

    return out.reshape(N, Cout, H, W)


def _reference(x, weight, bias):
    Cout, Cin = weight.shape[0], weight.shape[1]
    y = jnp.einsum("nchw,oc->nohw", x, weight.reshape(Cout, Cin))
    return y + bias.reshape(1, Cout, 1, 1)


if __name__ == "__main__":
    key = jax.random.PRNGKey(0)
    k_x, k_w, k_b, k_x2 = jax.random.split(key, 4)

    # Small shapes consistent with the module's forward.
    batch, in_channels, out_channels, spatial = 2, 4, 8, 16

    x = jax.random.normal(k_x, (batch, in_channels, spatial, spatial),
                          dtype=jnp.float32)

    # Deterministic parameter init (Conv2d(in, out, kernel_size=1) shapes),
    # mimicking PyTorch's default uniform(-1/sqrt(fan_in), 1/sqrt(fan_in)).
    fan_in = in_channels * 1 * 1
    bound = 1.0 / (fan_in ** 0.5)
    weight = jax.random.uniform(k_w, (out_channels, in_channels, 1, 1),
                                minval=-bound, maxval=bound,
                                dtype=jnp.float32)
    bias = jax.random.uniform(k_b, (out_channels,),
                              minval=-bound, maxval=bound, dtype=jnp.float32)

    # Default byte-targeted tiling (single spatial tile + batch tile of 2).
    y = jax.block_until_ready(input_channel_adapter(x, weight, bias))
    y_ref = _reference(x, weight, bias)
    assert y.shape == (batch, out_channels, spatial, spatial)
    assert jnp.allclose(y, y_ref, atol=1e-5, rtol=1e-5)

    # Ragged spatial tail: HW=225 with a forced 128-lane tile -> last block's
    # OOB lanes are masked on store by Pallas (no wrapper pad/slice).
    x2 = jax.random.normal(k_x2, (batch, in_channels, 15, 15),
                           dtype=jnp.float32)
    y2 = jax.block_until_ready(
        input_channel_adapter(x2, weight, bias, t_hw=128))
    assert y2.shape == (batch, out_channels, 15, 15)
    assert jnp.allclose(y2, _reference(x2, weight, bias), atol=1e-5, rtol=1e-5)

    # MXU fallback path (also what v7x auto-selects) on the same shape.
    y3 = jax.block_until_ready(
        input_channel_adapter(x2, weight, bias, prefer_mxu=True))
    assert jnp.allclose(y3, _reference(x2, weight, bias), atol=1e-5, rtol=1e-5)

    print("KERNEL_OK")
</pallas_src>

<mosaic_0001>
module attributes {stable_mosaic.version = 11 : i64} {
  func.func @_conv1x1_vpu_kernel(%arg0: i32, %arg1: i32, %arg2: memref<2x4x256xf32, #tpu.memory_space<vmem>>, %arg3: memref<8x4xf32, #tpu.memory_space<vmem>>, %arg4: memref<8x1xf32, #tpu.memory_space<vmem>>, %arg5: memref<2x8x256xf32, #tpu.memory_space<vmem>>) attributes {dimension_semantics = [#tpu.dimension_semantics<parallel>, #tpu.dimension_semantics<parallel>], iteration_bounds = array<i64: 1, 1>, scalar_prefetch = 0 : i64, scratch_operands = 0 : i64, tpu.core_type = #tpu.core_type<tc>, window_params = [{transform_indices = @transform_0, window_bounds = array<i64: 2, 4, 256>}, {pipeline_mode = #tpu.pipeline_mode<synchronous>, transform_indices = @transform_1, window_bounds = array<i64: 8, 4>}, {pipeline_mode = #tpu.pipeline_mode<synchronous>, transform_indices = @transform_2, window_bounds = array<i64: 8, 1>}, {transform_indices = @transform_3, window_bounds = array<i64: 2, 8, 256>}]} {
    %c0 = arith.constant 0 : index
    %c0_0 = arith.constant 0 : index
    %0 = vector.load %arg3[%c0, %c0_0] : memref<8x4xf32, #tpu.memory_space<vmem>>, vector<8x4xf32>
    %c0_1 = arith.constant 0 : index
    %c0_2 = arith.constant 0 : index
    %1 = vector.load %arg4[%c0_1, %c0_2] : memref<8x1xf32, #tpu.memory_space<vmem>>, vector<8x1xf32>
    %2 = vector.shape_cast %1 : vector<8x1xf32> to vector<8x1xf32>
    %3 = vector.broadcast %2 : vector<8x1xf32> to vector<8x256xf32>
    %4 = vector.extract_strided_slice %0 {offsets = [0, 0], sizes = [8, 1], strides = [1, 1]} : vector<8x4xf32> to vector<8x1xf32>
    %5 = vector.extract_strided_slice %0 {offsets = [0, 1], sizes = [8, 1], strides = [1, 1]} : vector<8x4xf32> to vector<8x1xf32>
    %6 = vector.extract_strided_slice %0 {offsets = [0, 2], sizes = [8, 1], strides = [1, 1]} : vector<8x4xf32> to vector<8x1xf32>
    %7 = vector.extract_strided_slice %0 {offsets = [0, 3], sizes = [8, 1], strides = [1, 1]} : vector<8x4xf32> to vector<8x1xf32>
    %c0_3 = arith.constant 0 : index
    %c0_4 = arith.constant 0 : index
    %c0_5 = arith.constant 0 : index
    %8 = vector.load %arg2[%c0_3, %c0_4, %c0_5] : memref<2x4x256xf32, #tpu.memory_space<vmem>>, vector<1x4x256xf32>
    %9 = vector.shape_cast %8 : vector<1x4x256xf32> to vector<4x256xf32>
    %10 = vector.extract_strided_slice %9 {offsets = [0, 0], sizes = [1, 256], strides = [1, 1]} : vector<4x256xf32> to vector<1x256xf32>
    %11 = vector.broadcast %4 : vector<8x1xf32> to vector<8x256xf32>
    %12 = vector.broadcast %10 : vector<1x256xf32> to vector<8x256xf32>
    %13 = arith.mulf %11, %12 : vector<8x256xf32>
    %14 = arith.addf %3, %13 : vector<8x256xf32>
    %15 = vector.extract_strided_slice %9 {offsets = [1, 0], sizes = [1, 256], strides = [1, 1]} : vector<4x256xf32> to vector<1x256xf32>
    %16 = vector.broadcast %5 : vector<8x1xf32> to vector<8x256xf32>
    %17 = vector.broadcast %15 : vector<1x256xf32> to vector<8x256xf32>
    %18 = arith.mulf %16, %17 : vector<8x256xf32>
    %19 = arith.addf %14, %18 : vector<8x256xf32>
    %20 = vector.extract_strided_slice %9 {offsets = [2, 0], sizes = [1, 256], strides = [1, 1]} : vector<4x256xf32> to vector<1x256xf32>
    %21 = vector.broadcast %6 : vector<8x1xf32> to vector<8x256xf32>
    %22 = vector.broadcast %20 : vector<1x256xf32> to vector<8x256xf32>
    %23 = arith.mulf %21, %22 : vector<8x256xf32>
    %24 = arith.addf %19, %23 : vector<8x256xf32>
    %25 = vector.extract_strided_slice %9 {offsets = [3, 0], sizes = [1, 256], strides = [1, 1]} : vector<4x256xf32> to vector<1x256xf32>
    %26 = vector.broadcast %7 : vector<8x1xf32> to vector<8x256xf32>
    %27 = vector.broadcast %25 : vector<1x256xf32> to vector<8x256xf32>
    %28 = arith.mulf %26, %27 : vector<8x256xf32>
    %29 = arith.addf %24, %28 : vector<8x256xf32>
    %c0_6 = arith.constant 0 : index
    %c0_7 = arith.constant 0 : index
    %c0_8 = arith.constant 0 : index
    %30 = vector.load %arg5[%c0_6, %c0_7, %c0_8] : memref<2x8x256xf32, #tpu.memory_space<vmem>>, vector<1x8x256xf32>
    %31 = vector.shape_cast %30 : vector<1x8x256xf32> to vector<8x256xf32>
    %32 = vector.shape_cast %29 : vector<8x256xf32> to vector<1x8x256xf32>
    tpu.vector_store %arg5[%c0_6, %c0_7, %c0_8], %32 {strides = array<i32>} : memref<2x8x256xf32, #tpu.memory_space<vmem>>, vector<1x8x256xf32>,
    %c1 = arith.constant 1 : index
    %c0_9 = arith.constant 0 : index
    %c0_10 = arith.constant 0 : index
    %33 = vector.load %arg2[%c1, %c0_9, %c0_10] : memref<2x4x256xf32, #tpu.memory_space<vmem>>, vector<1x4x256xf32>
    %34 = vector.shape_cast %33 : vector<1x4x256xf32> to vector<4x256xf32>
    %35 = vector.extract_strided_slice %34 {offsets = [0, 0], sizes = [1, 256], strides = [1, 1]} : vector<4x256xf32> to vector<1x256xf32>
    %36 = vector.broadcast %4 : vector<8x1xf32> to vector<8x256xf32>
    %37 = vector.broadcast %35 : vector<1x256xf32> to vector<8x256xf32>
    %38 = arith.mulf %36, %37 : vector<8x256xf32>
    %39 = arith.addf %3, %38 : vector<8x256xf32>
    %40 = vector.extract_strided_slice %34 {offsets = [1, 0], sizes = [1, 256], strides = [1, 1]} : vector<4x256xf32> to vector<1x256xf32>
    %41 = vector.broadcast %5 : vector<8x1xf32> to vector<8x256xf32>
    %42 = vector.broadcast %40 : vector<1x256xf32> to vector<8x256xf32>
    %43 = arith.mulf %41, %42 : vector<8x256xf32>
    %44 = arith.addf %39, %43 : vector<8x256xf32>
    %45 = vector.extract_strided_slice %34 {offsets = [2, 0], sizes = [1, 256], strides = [1, 1]} : vector<4x256xf32> to vector<1x256xf32>
    %46 = vector.broadcast %6 : vector<8x1xf32> to vector<8x256xf32>
    %47 = vector.broadcast %45 : vector<1x256xf32> to vector<8x256xf32>
    %48 = arith.mulf %46, %47 : vector<8x256xf32>
    %49 = arith.addf %44, %48 : vector<8x256xf32>
    %50 = vector.extract_strided_slice %34 {offsets = [3, 0], sizes = [1, 256], strides = [1, 1]} : vector<4x256xf32> to vector<1x256xf32>
    %51 = vector.broadcast %7 : vector<8x1xf32> to vector<8x256xf32>
    %52 = vector.broadcast %50 : vector<1x256xf32> to vector<8x256xf32>
    %53 = arith.mulf %51, %52 : vector<8x256xf32>
    %54 = arith.addf %49, %53 : vector<8x256xf32>
    %c1_11 = arith.constant 1 : index
    %c0_12 = arith.constant 0 : index
    %c0_13 = arith.constant 0 : index
    %55 = vector.load %arg5[%c1_11, %c0_12, %c0_13] : memref<2x8x256xf32, #tpu.memory_space<vmem>>, vector<1x8x256xf32>
    %56 = vector.shape_cast %55 : vector<1x8x256xf32> to vector<8x256xf32>
    %57 = vector.shape_cast %54 : vector<8x256xf32> to vector<1x8x256xf32>
    tpu.vector_store %arg5[%c1_11, %c0_12, %c0_13], %57 {strides = array<i32>} : memref<2x8x256xf32, #tpu.memory_space<vmem>>, vector<1x8x256xf32>,
    return
  }
  func.func @transform_0(%arg0: i32, %arg1: i32) -> (i32, i32, i32) {
    %c0_i32 = arith.constant 0 : i32
    %c0_i32_0 = arith.constant 0 : i32
    return %arg1, %c0_i32, %arg0 : i32, i32, i32
  }
  func.func @transform_1(%arg0: i32, %arg1: i32) -> (i32, i32) {
    %c0_i32 = arith.constant 0 : i32
    %c0_i32_0 = arith.constant 0 : i32
    %c0_i32_1 = arith.constant 0 : i32
    return %c0_i32, %c0_i32_0 : i32, i32
  }
  func.func @transform_2(%arg0: i32, %arg1: i32) -> (i32, i32) {
    %c0_i32 = arith.constant 0 : i32
    %c0_i32_0 = arith.constant 0 : i32
    %c0_i32_1 = arith.constant 0 : i32
    return %c0_i32, %c0_i32_0 : i32, i32
  }
  func.func @transform_3(%arg0: i32, %arg1: i32) -> (i32, i32, i32) {
    %c0_i32 = arith.constant 0 : i32
    %c0_i32_0 = arith.constant 0 : i32
    return %arg1, %c0_i32, %arg0 : i32, i32, i32
  }
}

</mosaic_0001>

<bundles_post_ra>
// kernel: tpu_custom_call.1
= control target key start
LH: loop header
LB: loop body
LE: loop exit
PB: predicated region body
PF: predicated region fallthrough
CT: control target
= control target key end

     0   :  { %v277_v1 = vmov 0   ;;  %v278_v2 = vmov 1   ;;  %s336_s0 = inlined_call_operand.vmem [shape: f32[2,4,256], index: 0, kind: input, shape index: {}]   ;;  %s337_s1 = inlined_call_operand.vmem [shape: f32[8,4], index: 1, kind: input, shape index: {}]   ;;  %s338_s2 = inlined_call_operand.vmem [shape: f32[8,1], index: 2, kind: input, shape index: {}]   ;;  %s339_s3 = inlined_call_operand.hbm [shape: f32[2,8,256], index: 3, kind: output, shape index: {}]  }
   0x1   :  { %v15_v0 = vld [vmem:[%s337_s1] sm:$0xff]  ;;  %249 = vset.pattern.permute.xlu0 %v277_v1  ;;  %250 = vset.pattern.permute.xlu1 %v278_v2 }
   0x2   :  { %8 = vsyncpa [#allocation3], 0  ;;  %25 = vperm.xlu0 %249, %v15_v0   ;;  %52 = vperm.xlu1 %250, %v15_v0   ;;  %v16_v3 = vld [vmem:[%s338_s2] sm:$0xff]  ;;  %v279_v4 = vmov 2   ;;  %v280_v5 = vmov 3   ;;  %v29_v6 = vlaneseq  ;;  %v241_v11 = vld [vmem:[%s336_s0 + $0x8] sm:$0xff] }
   0x3   :  { %v22_v10 = vld [vmem:[%s336_s0] sm:$0xff]  ;;  %s281_s0 = smov [#allocation2]  }
   0x4   :  { %v30_v7 = vshrl.u32 %v29_v6, 7  ;;  %s230_s2 = sshll.u32 %s281_s0, 4  ;;  %s231_s2 = int_to_ptr.vmem [resolvable:$true] %s230_s2 }
   0x5   :  { %s253_s19 = scalar_lea.vmem %s231_s2, 512  ;;  %p258_p1 = scmp.lt.s32.totalorder %s231_s2, %s231_s2 }
   0x6   :  { %19 = vperm.xlu0 %249, %v16_v3   ;;  %251 = vset.pattern.permute.xlu1 %v279_v4  ;;  %v31_v8 = vsub.s32 0, %v30_v7  ;;  %v35_v9 = vsub.s32 4, %v30_v7  ;;  %v57_v12 = vsub.s32 1, %v30_v7  ;;  %v61_v13 = vsub.s32 5, %v30_v7  ;;  %p254_p0 = scmp.ne.s32.totalorder %s231_s2, %s253_s19  ;;  %p259_p2 = scmp.lt.s32.totalorder %s253_s19, %s253_s19 }
   0x7   :  { %78 = vperm.xlu1 %251, %v15_v0   ;;  %v83_v14 = vsub.s32 2, %v30_v7  ;;  %v87_v15 = vsub.s32 6, %v30_v7  ;;  %v316_v16 = vsub.s32 3, %v30_v7  ;;  %v113_v17 = vsub.s32 7, %v30_v7 }
   0x8   :  { %v32_v18 = vrot.slane %v22_v10, %v31_v8  ;;  %v36_v19 = vrot.slane %v22_v10, %v35_v9  ;;  %v137_v20 = vrot.slane %v241_v11, %v31_v8  ;;  %v141_v21 = vrot.slane %v241_v11, %v35_v9  ;;  %p260_p3 = por %p259_p2, %p258_p1 }
   0x9   :  { %v58_v22 = vrot.slane %v22_v10, %v57_v12  ;;  %v62_v23 = vrot.slane %v22_v10, %v61_v13  ;;  %v159_v24 = vrot.slane %v241_v11, %v57_v12  ;;  %v163_v25 = vrot.slane %v241_v11, %v61_v13 }
   0xa   :  { %252 = vset.pattern.permute.xlu0 %v280_v5  ;;  %v84_v26 = vrot.slane %v22_v10, %v83_v14  ;;  %v88_v27 = vrot.slane %v22_v10, %v87_v15  ;;  %v181_v28 = vrot.slane %v241_v11, %v83_v14  ;;  %v185_v29 = vrot.slane %v241_v11, %v87_v15  ;;  %p261_p4 = pnand %p260_p3, %p254_p0 }
   0xb   :  { %104 = vperm.xlu0 %252, %v15_v0   ;;  %v110_v30 = vrot.slane %v22_v10, %v316_v16  ;;  %v114_v31 = vrot.slane %v22_v10, %v113_v17  ;;  %v203_v32 = vrot.slane %v241_v11, %v316_v16  ;;  %v207_v33 = vrot.slane %v241_v11, %v113_v17 }
   0xc   :  { %v42_v34 = vrot.slane %v32_v18, %v31_v8  ;;  %v46_v35 = vrot.slane %v36_v19, %v31_v8  ;;  %v147_v36 = vrot.slane %v137_v20, %v31_v8  ;;  %v151_v37 = vrot.slane %v141_v21, %v31_v8 }
   0xd   :  { %v68_v39 = vrot.slane %v58_v22, %v57_v12  ;;  %v72_v40 = vrot.slane %v62_v23, %v57_v12  ;;  %v169_v41 = vrot.slane %v159_v24, %v57_v12  ;;  %v173_v42 = vrot.slane %v163_v25, %v57_v12 }
   0xe   :  { %v94_v44 = vrot.slane %v84_v26, %v83_v14  ;;  %v98_v45 = vrot.slane %v88_v27, %v83_v14  ;;  %v191_v46 = vrot.slane %v181_v28, %v83_v14  ;;  %v195_v47 = vrot.slane %v185_v29, %v83_v14 }
   0xf   :  { %v120_v48 = vrot.slane %v110_v30, %v316_v16  ;;  %v124_v49 = vrot.slane %v114_v31, %v316_v16  ;;  %v213_v50 = vrot.slane %v203_v32, %v316_v16  ;;  %v217_v51 = vrot.slane %v207_v33, %v316_v16 }
  0x81   :  { %v26_v38 = vpop.permute.xlu0 %25  ;;  %v53_v43 = vpop.permute.xlu1 %52 }
  0x82   :  { %v47_v52 = vmul.f32 %v42_v34, %v26_v38  ;;  %v48_v53 = vmul.f32 %v46_v35, %v26_v38  ;;  %v152_v54 = vmul.f32 %v147_v36, %v26_v38  ;;  %v153_v55 = vmul.f32 %v151_v37, %v26_v38 }
  0x83   :  { %v73_v56 = vmul.f32 %v68_v39, %v53_v43  ;;  %v74_v57 = vmul.f32 %v72_v40, %v53_v43  ;;  %v174_v58 = vmul.f32 %v169_v41, %v53_v43  ;;  %v175_v59 = vmul.f32 %v173_v42, %v53_v43 }
  0x85   :  { %v20_v60 = vpop.permute.xlu0 %19 }
  0x86   :  { %v49_v61 = vadd.f32 %v47_v52, %v20_v60  ;;  %v50_v62 = vadd.f32 %v48_v53, %v20_v60  ;;  %v154_v63 = vadd.f32 %v152_v54, %v20_v60  ;;  %v155_v0 = vadd.f32 %v153_v55, %v20_v60  ;;  %v79_v1 = vpop.permute.xlu1 %78 }
  0x87   :  { %v99_v2 = vmul.f32 %v94_v44, %v79_v1  ;;  %v100_v3 = vmul.f32 %v98_v45, %v79_v1  ;;  %v196_v4 = vmul.f32 %v191_v46, %v79_v1  ;;  %v197_v5 = vmul.f32 %v195_v47, %v79_v1 }
  0x88   :  { %v75_v6 = vadd.f32 %v73_v56, %v49_v61  ;;  %v76_v7 = vadd.f32 %v74_v57, %v50_v62  ;;  %v176_v8 = vadd.f32 %v174_v58, %v154_v63  ;;  %v177_v9 = vadd.f32 %v175_v59, %v155_v0 }
  0x8a   :  { %v101_v10 = vadd.f32 %v99_v2, %v75_v6  ;;  %v102_v11 = vadd.f32 %v100_v3, %v76_v7  ;;  %v198_v12 = vadd.f32 %v196_v4, %v176_v8  ;;  %v199_v13 = vadd.f32 %v197_v5, %v177_v9  ;;  %v105_v14 = vpop.permute.xlu0 %104 }
  0x8b   :  { %v125_v15 = vmul.f32 %v120_v48, %v105_v14  ;;  %v126_v16 = vmul.f32 %v124_v49, %v105_v14  ;;  %v218_v17 = vmul.f32 %v213_v50, %v105_v14  ;;  %v219_v18 = vmul.f32 %v217_v51, %v105_v14 }
  0x8d   :  { %v127_v19 = vadd.f32 %v125_v15, %v101_v10  ;;  %v128_v20 = vadd.f32 %v126_v16, %v102_v11  ;;  %v220_v21 = vadd.f32 %v218_v17, %v198_v12  ;;  %v221_v22 = vadd.f32 %v219_v18, %v199_v13 }
  0x8f   :  { %129 = vst [vmem:[#allocation2] sm:$0xff] %v127_v19  ;;  %130 = vst [vmem:[#allocation2 + $0x8] sm:$0xff] %v128_v20 }
  0x90   :  { %223 = vst [vmem:[#allocation2 + $0x10] sm:$0xff] %v220_v21  ;;  %224 = vst [vmem:[#allocation2 + $0x18] sm:$0xff] %v221_v22 }
  0x91   :  { %264 = shalt.err (!%p261_p4)
}
  0x92   :  { %s265_s22 = scalar_lea.hbm %s339_s3, 512 }
  0x93   :  { %p266_p5 = scmp.ne.s32.totalorder %s339_s3, %s265_s22  ;;  %p269_p6 = scmp.lt.u32.totalorder %s265_s22, %s339_s3 }
  0x95   :  { %p271_p7 = pnand %p269_p6, %p266_p5 }
  0x97   :  { %274 = shalt.err (!%p271_p7)
}
  0x98   :  { %s282_s27 = smov 256   ;;  %s283_s28 = smov 16  }
  0x99   :  { %236 = dma.vmem_to_hbm [thread:$0]  %s231_s2, 512, %s339_s3, [#allocation3], %s282_s27, %s282_s27, %s283_s28  }
  0x9a   :  { %275 = dma.done.wait [#allocation3], 512  }
  0x9b   :  { %276 = vsyncadd [#allocation3], 4294966784 }
  0x9c   :  { %240 = vsyncpa [#allocation3], 1 }

</bundles_post_ra>
